<compile_context>
chip_gen: v7x
topology: tpu7x:2x2x1
jax: 0.10.0
libtpu: 0.0.40
codegen_flags: <defaults>
</compile_context>

<pallas_src>
import functools
import math

import jax
import jax.numpy as jnp
from jax.experimental import pallas as pl
from jax.experimental.pallas import tpu as pltpu

LANE = 128

# VMEM budgets, conservative for v7x (64 MiB physical / TC), assuming the
# default 2 pipeline buffers per operand.
_RESIDENT_W_BYTES = 12 << 20    # fully-resident fused weight (x2 buffers -> 24 MiB)
_TILED_W_SLAB_BYTES = 8 << 20   # per-slab budget when N-tiling (x2 -> 16 MiB)
_VMEM_SOFT_CAP = 40 << 20       # total working-set soft cap
_VMEM_LIMIT_MAX = 52 << 20      # never request more scoped VMEM than this
_VMEM_LIMIT_MIN = 32 << 20      # raise v5e's 16 MiB default; harmless elsewhere


def _round_up(n, m):
    return ((n + m - 1) // m) * m


def _sublane_multiple(dtype):
    # rows packed per sublane: f32 -> 8, bf16 -> 16, int8/fp8 -> 32
    return {4: 8, 2: 16, 1: 32}[jnp.dtype(dtype).itemsize]


def _pick_tn(out_p, in_p, itemsize, slab_budget):
    """Largest multiple-of-128 divisor of out_p whose weight slab fits the budget."""
    n128 = out_p // LANE
    best = LANE  # fall back to 128 even if over budget
    for mult in range(1, n128 + 1):
        if n128 % mult == 0:
            tn = mult * LANE
            if in_p * tn * itemsize <= slab_budget:
                best = tn
    return best


# -----------------------------------------------------------------------------
# Parameter fusion (run ONCE, at parameter-load time -- not in the hot path).
# -----------------------------------------------------------------------------
def fuse_params(w1, b1, w2, b2, *, compute_dtype=jnp.bfloat16):
    """hidden1 then hidden4 with no activation in between is exactly
        y = x @ (W1 @ W2) + (b1 @ W2 + b2)
    so we precompute the fused affine map once.  Returns a lane-padded
    (multiple-of-128) fused weight in `compute_dtype`, an f32 fused bias row,
    and the true output size (for un-padding the result)."""
    in_size = w1.shape[0]
    out_size = w2.shape[1]
    w_fused = jnp.dot(w1.astype(jnp.float32), w2.astype(jnp.float32),
                      preferred_element_type=jnp.float32)           # [in, out]
    b_fused = (jnp.dot(b1.astype(jnp.float32), w2.astype(jnp.float32),
                       preferred_element_type=jnp.float32)
               + b2.astype(jnp.float32))                            # [1, out]
    in_p = _round_up(in_size, LANE)
    out_p = _round_up(out_size, LANE)
    w_p = jnp.pad(w_fused, ((0, in_p - in_size), (0, out_p - out_size)))
    b_p = jnp.pad(b_fused, ((0, 0), (0, out_p - out_size))).astype(jnp.float32)
    if compute_dtype is not None:
        w_p = w_p.astype(compute_dtype)
    return w_p, b_p, out_size


# -----------------------------------------------------------------------------
# Kernel: single fused affine map + ReLU.
# -----------------------------------------------------------------------------
def _eps_generator_kernel(x_ref, w_ref, b_ref, o_ref):
    acc = jnp.dot(x_ref[...], w_ref[...], preferred_element_type=jnp.float32)
    acc = acc + b_ref[...]
    o_ref[...] = jnp.maximum(acc, 0.0).astype(o_ref.dtype)


# -----------------------------------------------------------------------------
# Forward (hot path).  Jitted so pad + cast fuse into one HBM pass.
# -----------------------------------------------------------------------------
@functools.partial(
    jax.jit,
    static_argnames=("out_size", "block_batch",
                     "max_resident_weight_bytes", "max_weight_slab_bytes"))
def eps_generator_forward(x, w_fused, b_fused, *, out_size, block_batch=1024,
                          max_resident_weight_bytes=None,
                          max_weight_slab_bytes=None):
    """x: [B, in];  w_fused: [in_p, out_p] (lane-padded);  b_fused: [1, out_p] f32."""
    batch, in_size = x.shape
    in_p, out_p = w_fused.shape
    compute_dtype = w_fused.dtype
    out_dtype = x.dtype
    c_size = jnp.dtype(compute_dtype).itemsize
    o_size = jnp.dtype(out_dtype).itemsize

    resident_budget = (_RESIDENT_W_BYTES if max_resident_weight_bytes is None
                       else max_resident_weight_bytes)
    slab_budget = (_TILED_W_SLAB_BYTES if max_weight_slab_bytes is None
                   else max_weight_slab_bytes)

    # ---- N tiling decision (keeps the weight slab inside a v7x-safe budget) ----
    if in_p * out_p * c_size <= resident_budget:
        tn = out_p                                       # fully resident weight
    else:
        tn = _pick_tn(out_p, in_p, c_size, slab_budget)  # (in_p, tn) slabs
    num_n = out_p // tn
    w_vmem = 2 * in_p * tn * c_size                      # assume 2 pipeline buffers

    # ---- batch tile ------------------------------------------------------------
    sub = _sublane_multiple(compute_dtype)               # 16 for bf16, 8 for f32
    batch_sub = _round_up(batch, sub)
    tb = min(_round_up(block_batch, sub), batch_sub)
    num_m0 = -(-batch_sub // tb)
    if batch_sub >= 2 * sub:
        num_m0 = max(num_m0, 2)   # >= 2 grid steps so both v7x TCs get work
    tb = _round_up(-(-batch_sub // num_m0), sub)         # equalize -> minimal padding

    def _vmem_need(tb_):
        return (2 * tb_ * in_p * c_size        # x tiles (double-buffered)
                + 2 * tb_ * tn * o_size        # out tiles (double-buffered)
                + w_vmem                       # weight slab(s)
                + 2 * tn * 4)                  # bias slab(s)

    while tb > sub and _vmem_need(tb) > _VMEM_SOFT_CAP:
        tb = max(sub, _round_up(tb // 2, sub))
    batch_p = _round_up(batch_sub, tb)
    num_m = batch_p // tb

    # ---- pad + cast x (fuses into one HBM pass under jit) -----------------------
    x_p = x
    if batch_p != batch or in_p != in_size:
        x_p = jnp.pad(x_p, ((0, batch_p - batch), (0, in_p - in_size)))
    if x_p.dtype != compute_dtype:
        x_p = x_p.astype(compute_dtype)

    vmem_limit = int(min(max(_vmem_need(tb) * 5 // 4 + (2 << 20), _VMEM_LIMIT_MIN),
                         _VMEM_LIMIT_MAX))

    cost = pl.CostEstimate(
        flops=2 * batch_p * in_p * out_p,
        transcendentals=0,
        bytes_accessed=(batch_p * in_p * c_size + in_p * out_p * c_size
                        + out_p * 4 + batch_p * out_p * o_size),
    )

    # Grid = (n, m) with the batch axis innermost: the (in_p, tn) weight slab is
    # grid-invariant across the whole inner batch sweep (one HBM read of the
    # weight in total); x/out tiles stream through the BlockSpec pipeline.
    out_padded = pl.pallas_call(
        _eps_generator_kernel,
        out_shape=jax.ShapeDtypeStruct((batch_p, out_p), out_dtype),
        grid=(num_n, num_m),
        in_specs=[
            pl.BlockSpec((tb, in_p), lambda j, i: (i, 0)),   # x tile (streamed)
            pl.BlockSpec((in_p, tn), lambda j, i: (0, j)),   # fused weight slab
            pl.BlockSpec((1, tn), lambda j, i: (0, j)),      # fused bias slab
        ],
        out_specs=pl.BlockSpec((tb, tn), lambda j, i: (i, j)),
        compiler_params=pltpu.CompilerParams(
            dimension_semantics=("parallel", "parallel"),
            vmem_limit_bytes=vmem_limit,
        ),
        cost_estimate=cost,
    )(x_p, w_fused, b_fused)

    if batch_p == batch and out_p == out_size:
        return out_padded
    return out_padded[:batch, :out_size]


# -----------------------------------------------------------------------------
# Param init (PyTorch-style) and un-fused reference.
# -----------------------------------------------------------------------------
def init_params(key, input_size, output_size, dtype=jnp.float32):
    k1, k2, k3, k4 = jax.random.split(key, 4)
    bound = 1.0 / math.sqrt(input_size)
    # stored as [in, out] (transposed relative to torch's [out, in])
    w1 = jax.random.uniform(k1, (input_size, input_size), dtype, -bound, bound)
    b1 = jax.random.uniform(k2, (1, input_size), dtype, -bound, bound)
    w2 = jax.random.uniform(k3, (input_size, output_size), dtype, -bound, bound)
    b2 = jax.random.uniform(k4, (1, output_size), dtype, -bound, bound)
    return w1, b1, w2, b2


def reference_forward(x, w1, b1, w2, b2):
    # Un-fused f32 reference, matching the PyTorch forward exactly.
    h = x @ w1 + b1
    out = h @ w2 + b2
    return jnp.maximum(out, 0.0)


if __name__ == "__main__":
    batch = 32
    input_size = 32
    output_size = 16

    key = jax.random.PRNGKey(0)
    kx, kp, kp2 = jax.random.split(key, 3)
    x = jax.random.normal(kx, (batch, input_size), jnp.float32)
    w1, b1, w2, b2 = init_params(kp, input_size, output_size)
    ref = reference_forward(x, w1, b1, w2, b2)

    # 1) f32 compute path: exact-ish check of the kernel + algebraic fusion.
    #    block_batch=16 exercises a 2-step batch grid at this tiny size.
    wf, bf, osz = fuse_params(w1, b1, w2, b2, compute_dtype=jnp.float32)
    out_f32 = jax.block_until_ready(
        eps_generator_forward(x, wf, bf, out_size=osz, block_batch=16))
    assert out_f32.shape == (batch, output_size)
    assert jnp.allclose(out_f32, ref, atol=1e-4, rtol=1e-4), (
        float(jnp.max(jnp.abs(out_f32 - ref))))

    # 2) Default (bf16 compute) production path.
    wb, bb, osz = fuse_params(w1, b1, w2, b2)
    out_bf16 = jax.block_until_ready(
        eps_generator_forward(x, wb, bb, out_size=osz, block_batch=16))
    assert out_bf16.shape == (batch, output_size)
    assert jnp.allclose(out_bf16, ref, atol=5e-2, rtol=5e-2), (
        float(jnp.max(jnp.abs(out_bf16 - ref))))

    # 3) Exercise the N-tiled (large fused weight / v7x VMEM) fallback by forcing
    #    tiny budgets on a wider output.
    out2 = 200
    w1b, b1b, w2b, b2b = init_params(kp2, input_size, out2)
    ref2 = reference_forward(x, w1b, b1b, w2b, b2b)
    wn, bn, oszn = fuse_params(w1b, b1b, w2b, b2b)
    out_tiled = jax.block_until_ready(
        eps_generator_forward(x, wn, bn, out_size=oszn, block_batch=16,
                              max_resident_weight_bytes=1,
                              max_weight_slab_bytes=1))
    assert out_tiled.shape == (batch, out2)
    assert jnp.allclose(out_tiled, ref2, atol=5e-2, rtol=5e-2), (
        float(jnp.max(jnp.abs(out_tiled - ref2))))

    print("KERNEL_OK")
</pallas_src>

<mosaic_0001>
module attributes {stable_mosaic.version = 11 : i64} {
  func.func @_eps_generator_kernel(%arg0: i32, %arg1: i32, %arg2: memref<16x128xf32, #tpu.memory_space<vmem>>, %arg3: memref<128x128xf32, #tpu.memory_space<vmem>>, %arg4: memref<1x128xf32, #tpu.memory_space<vmem>>, %arg5: memref<16x128xf32, #tpu.memory_space<vmem>>) attributes {dimension_semantics = [#tpu.dimension_semantics<parallel>, #tpu.dimension_semantics<parallel>], iteration_bounds = array<i64: 1, 2>, scalar_prefetch = 0 : i64, scratch_operands = 0 : i64, tpu.core_type = #tpu.core_type<tc>, window_params = [{transform_indices = @transform_0, window_bounds = array<i64: 16, 128>}, {transform_indices = @transform_1, window_bounds = array<i64: 128, 128>}, {transform_indices = @transform_2, window_bounds = array<i64: 1, 128>}, {transform_indices = @transform_3, window_bounds = array<i64: 16, 128>}]} {
    %c0 = arith.constant 0 : index
    %c0_0 = arith.constant 0 : index
    %0 = vector.load %arg2[%c0, %c0_0] : memref<16x128xf32, #tpu.memory_space<vmem>>, vector<16x128xf32>
    %c0_1 = arith.constant 0 : index
    %c0_2 = arith.constant 0 : index
    %1 = vector.load %arg3[%c0_1, %c0_2] : memref<128x128xf32, #tpu.memory_space<vmem>>, vector<128x128xf32>
    %cst = arith.constant dense<0.000000e+00> : vector<16x128xf32>
    %2 = tpu.matmul %0, %1, %cst {dimension_numbers = #tpu.dot_dimension_numbers<[1], [0], [0], [1], [0, 0, 1, 1], [], []>} : vector<16x128xf32>, vector<128x128xf32>, vector<16x128xf32> -> vector<16x128xf32>
    %c0_3 = arith.constant 0 : index
    %c0_4 = arith.constant 0 : index
    %3 = vector.load %arg4[%c0_3, %c0_4] : memref<1x128xf32, #tpu.memory_space<vmem>>, vector<1x128xf32>
    %4 = vector.broadcast %3 : vector<1x128xf32> to vector<16x128xf32>
    %5 = arith.addf %2, %4 : vector<16x128xf32>
    %cst_5 = arith.constant 0.000000e+00 : f32
    %6 = vector.broadcast %cst_5 : f32 to vector<16x128xf32>
    %7 = arith.maximumf %5, %6 : vector<16x128xf32>
    %c0_6 = arith.constant 0 : index
    %c0_7 = arith.constant 0 : index
    %8 = vector.load %arg5[%c0_6, %c0_7] : memref<16x128xf32, #tpu.memory_space<vmem>>, vector<16x128xf32>
    tpu.vector_store %arg5[%c0_6, %c0_7], %7 {strides = array<i32>} : memref<16x128xf32, #tpu.memory_space<vmem>>, vector<16x128xf32>,
    return
  }
  func.func @transform_0(%arg0: i32, %arg1: i32) -> (i32, i32) {
    %c0_i32 = arith.constant 0 : i32
    %c0_i32_0 = arith.constant 0 : i32
    return %arg1, %c0_i32 : i32, i32
  }
  func.func @transform_1(%arg0: i32, %arg1: i32) -> (i32, i32) {
    %c0_i32 = arith.constant 0 : i32
    %c0_i32_0 = arith.constant 0 : i32
    return %c0_i32, %arg0 : i32, i32
  }
  func.func @transform_2(%arg0: i32, %arg1: i32) -> (i32, i32) {
    %c0_i32 = arith.constant 0 : i32
    %c0_i32_0 = arith.constant 0 : i32
    return %c0_i32, %arg0 : i32, i32
  }
  func.func @transform_3(%arg0: i32, %arg1: i32) -> (i32, i32) {
    %c0_i32 = arith.constant 0 : i32
    return %arg1, %arg0 : i32, i32
  }
}

</mosaic_0001>

<bundles_post_ra>
// kernel: eps_generator_forward.1
= control target key start
LH: loop header
LB: loop body
LE: loop exit
PB: predicated region body
PF: predicated region fallthrough
CT: control target
= control target key end

     0   :  { %8 = vsyncpa [#allocation3], 0  ;;  %s651_s12 = smov 0   ;;  %s653_s13 = smov 0   ;;  %s740_s0 = inlined_call_operand.vmem [shape: f32[32,128], index: 0, kind: input, shape index: {}]   ;;  %s741_s1 = inlined_call_operand.hbm [shape: f32[128,128], index: 1, kind: input, shape index: {}]   ;;  %s742_s2 = inlined_call_operand.vmem [shape: f32[1,128], index: 2, kind: input, shape index: {}]   ;;  %s743_s3 = inlined_call_operand.vmem [shape: f32[32,128], index: 3, kind: output, shape index: {}]  }
   0x1   :  { %s655_s14 = smov 0  }
   0x2 LB: > { %s435_s15 = sadd.s32 4294967295, %s626_s14   ;;  %s23_s16 = sadd.s32 1, %s622_s13  ;;  %s626_s14 = sphi %s655_s14, %s14_s14   ;;  %s622_s13 = sphi %s653_s13, %s753_s13   ;;  %s618_s12 = sphi %s651_s12, %s752_s12  }
   0x3   : > { %p24_p0 = scmp.ge.s32.totalorder %s23_s16, 2  ;;  %p437_p1 = scmp.ge.s32.totalorder %s626_s14, 1 }
   0x4   : > { %p137_p2 = scmp.lt.s32.totalorder %s626_s14, 3  ;;  %p676_p4 = scmp.eq.s32.totalorder %s435_s15, 0 }
   0x5   : > { %s755_s16 = smov (%p24_p0, %s23_s16), 0  ;;  %s628_s19 = smov [#allocation2]  }
   0x6   : > { %p672_p3 = pnand %p437_p1, %p137_p2  ;;  %s151_s20 = sshll.u32 %s628_s19, 4  ;;  %s152_s20 = int_to_ptr.vmem [resolvable:$true] %s151_s20 }
   0x7   : > { %s748_s18 = scalar_select %p676_p4, 1, 0 }
   0x8   : > { %s747_s17 = scalar_select %p672_p3, 1, 0 }
   0x9   : > { %p539_p5 = pneg %p672_p3  ;;  %s572_s24 = scalar_lea.hbm %s741_s1, 2048 }
   0xa   : > { %p573_p7 = scmp.ne.s32.totalorder %s741_s1, %s572_s24  ;;  %p579_p11 = scmp.lt.u32.totalorder %s572_s24, %s741_s1 }
   0xb   : > { %p684_p6 = pnand %p676_p4, %p539_p5 }
   0xd   : > { %p574_p8 = pneg %p684_p6 }
   0xf   : > { %p575_p9 = pnand %p574_p8, %p573_p7 }
  0x11   : > { %p576_p10 = pneg %p575_p9 }
  0x13   : > { %p581_p12 = pnand %p579_p11, %p576_p10 }
  0x15   : > { %584 = shalt.err (!%p581_p12)
}
  0x16   : > { %s585_s29 = scalar_lea.vmem %s152_s20, 2048  ;;  %p593_p2 = scmp.lt.s32.totalorder %s152_s20, %s152_s20 }
  0x17   : > { %p586_p13 = scmp.ne.s32.totalorder %s152_s20, %s585_s29  ;;  %p594_p5 = scmp.lt.s32.totalorder %s585_s29, %s585_s29 }
  0x19   : > { %p588_p0 = pnand %p586_p13, %p574_p8  ;;  %p595_p4 = por %p594_p5, %p593_p2 }
  0x1b   : > { %p589_p1 = pneg %p588_p0 }
  0x1d   : > { %p596_p3 = pnand %p595_p4, %p589_p1 }
  0x1f   : > { %599 = shalt.err (!%p596_p3)
}
  0x20   : > { %s629_s30 = smov 128   ;;  %s630_s4 = smov 8  }
  0x21   : > { %542 = dma.hbm_to_vmem [thread:$0]  (!%p684_p6), %s741_s1, 2048, %s152_s20, [#allocation3], %s629_s30, %s629_s30, %s630_s4  }
  0x22   : > { %p750_p7 = scmp.ne.s32.totalorder %s747_s17, 0 }
  0x23   : > { %p751_p9 = scmp.ne.s32.totalorder (!%p750_p7), %s748_s18, 0 }
  0x24   : > { %182 = sbr.rel (%p750_p7) target bundleno = 297 (0x129), region = 32 }
  0x2b   : > { %613 = dma.done.wait (%p751_p9), [#allocation3], 2048  }
  0x2c   : > { %615 = vsyncadd (%p751_p9), [#allocation3], 4294965248  ;;  %s443_s7 = sshll.u32 %s618_s12, 1  ;;  %v232_v0 = vld [vmem:[#allocation2] sm:$0xff]  ;;  %v233_v1 = vld [vmem:[#allocation2 + $0x8] sm:$0xff] }
  0x2d   : > { %p213_p3 = scmp.lt.s32.totalorder %s443_s7, 3  ;;  %v234_v2 = vld [vmem:[#allocation2 + $0x10] sm:$0xff]  ;;  %v503_v3 = vpack.c.bf16 %v233_v1, %v232_v0  ;;  %v235_v4 = vld [vmem:[#allocation2 + $0x18] sm:$0xff]  ;;  %v236_v6 = vld [vmem:[#allocation2 + $0x20] sm:$0xff] }
  0x2e   : > { %v507_v5 = vpack.c.bf16 %v235_v4, %v234_v2  ;;  %v237_v7 = vld [vmem:[#allocation2 + $0x28] sm:$0xff]  ;;  %v238_v10 = vld [vmem:[#allocation2 + $0x30] sm:$0xff]  ;;  %v239_v11 = vld [vmem:[#allocation2 + $0x38] sm:$0xff] }
  0x2f   : > { %s757_s7 = smov (!%p213_p3, %s443_s7), 3  ;;  %504 = vmatprep.subr.bf16.mxu0 %v503_v3  ;;  %v511_v8 = vpack.c.bf16 %v237_v7, %v236_v6  ;;  %v515_v12 = vpack.c.bf16 %v239_v11, %v238_v10  ;;  %v240_v13 = vld [vmem:[#allocation2 + $0x40] sm:$0xff]  ;;  %v241_v14 = vld [vmem:[#allocation2 + $0x48] sm:$0xff]  ;;  %v242_v16 = vld [vmem:[#allocation2 + $0x50] sm:$0xff] }
  0x30   : > { %s444_s8 = sshll.u32 %s757_s7, 3  ;;  %506 = vmatpush3.bf16.msra.mxu0 %v503_v3  ;;  %v519_v15 = vpack.c.bf16 %v241_v14, %v240_v13  ;;  %v243_v17 = vld [vmem:[#allocation2 + $0x58] sm:$0xff]  ;;  %v244_v19 = vld [vmem:[#allocation2 + $0x60] sm:$0xff]  ;;  %v245_v20 = vld [vmem:[#allocation2 + $0x68] sm:$0xff] }
  0x31   : > { %s719_s11 = scalar_lea.vmem %s740_s0, %s444_s8  ;;  %508 = vmatprep.subr.bf16.mxu0 %v507_v5  ;;  %v523_v18 = vpack.c.bf16 %v243_v17, %v242_v16  ;;  %v527_v21 = vpack.c.bf16 %v245_v20, %v244_v19  ;;  %v246_v22 = vld [vmem:[#allocation2 + $0x70] sm:$0xff]  ;;  %v247_v23 = vld [vmem:[#allocation2 + $0x78] sm:$0xff]  ;;  %v447_v26 = vld [vmem:[%s742_s2] ss:$0 sm:$0xff]  ;;  %s228_s19 = scalar_lea.vmem %s743_s3, %s444_s8 }
  0x32   : > { %v230_v9 = vld [vmem:[%s719_s11] sm:$0xff]  ;;  %v531_v24 = vpack.c.bf16 %v247_v23, %v246_v22  ;;  %v231_v25 = vld [vmem:[%s719_s11 + $0x8] sm:$0xff] }
  0x33   : > { %500 = vmatprep.mubr.f32.mxu0 %v230_v9 }
  0x34   : > { %510 = vmatpush3.bf16.msra.mxu0 %v507_v5 }
  0x35   : > { %512 = vmatprep.subr.bf16.mxu0 %v511_v8 }
  0x38   : > { %514 = vmatpush3.bf16.msra.mxu0 %v511_v8 }
  0x39   : > { %516 = vmatprep.subr.bf16.mxu0 %v515_v12 }
  0x3c   : > { %518 = vmatpush3.bf16.msra.mxu0 %v515_v12 }
  0x3d   : > { %520 = vmatprep.subr.bf16.mxu0 %v519_v15 }
  0x40   : > { %522 = vmatpush3.bf16.msra.mxu0 %v519_v15 }
  0x41   : > { %524 = vmatprep.subr.bf16.mxu0 %v523_v18 }
  0x44   : > { %526 = vmatpush3.bf16.msra.mxu0 %v523_v18 }
  0x45   : > { %528 = vmatprep.subr.bf16.mxu0 %v527_v21 }
  0x48   : > { %530 = vmatpush3.bf16.msra.mxu0 %v527_v21 }
  0x49   : > { %532 = vmatprep.subr.bf16.mxu0 %v531_v24 }
  0x4c   : > { %534 = vmatpush3.bf16.msra.mxu0 %v531_v24 }
  0x4f   : > { %501 = vmatmul.mubr.f32.vlgmr.msra.gmra.mrb[0].mxu0 %v231_v25 }
 0x122   : > { %v502_v27 = vpop.f32.mrb[0].mxu0 }
 0x123   : > { %v327_v28 = vadd.f32 %v502_v27, %v447_v26  ;;  %v321_v29 = vpop.f32.mrb[1].mxu0 }
 0x124   : > { %v322_v30 = vadd.f32 %v447_v26, %v321_v29 }
 0x125   : > { %v331_v32 = vmax.f32 %v327_v28, 0.0 }
 0x126   : > { %v330_v31 = vmax.f32 %v322_v30, 0.0 }
 0x127   : > { %333 = vst [vmem:[%s228_s19 + $0x8] sm:$0xff] %v331_v32 }
 0x128   : > { %332 = vst [vmem:[%s228_s19] sm:$0xff] %v330_v31 }
 0x129 PF: > { %s14_s14 = sadd.s32 1, %s626_s14   ;;  %s752_s12 = smov %s622_s13 }
 0x12a   : > { %p11_p4 = scmp.ge.s32.totalorder %s14_s14, 4   ;;  %s753_s13 = smov %s755_s16 }
 0x12c   :  { %13 = sbr.rel (!%p11_p4) target bundleno = 2 (0x2), region = 71 }
 0x133   :  { %362 = vsyncpa [#allocation3], 1 }
 0x134   :  { %364 = vsyncpa [#allocation3 + $0x1], 1 }

</bundles_post_ra>
